<compile_context>
chip_gen: v5e
topology: v5e:2x2
jax: 0.10.0
libtpu: 0.0.40
codegen_flags: <defaults>
</compile_context>

<pallas_src>
import functools

import jax
import jax.numpy as jnp
from jax.experimental import pallas as pl
from jax.experimental.pallas import tpu as pltpu

LANE = 128          # lane width — pad narrow matmul widths up to this
SUBLANE_ALIGN = 16  # bf16 sublane packing for the batch (sublane) axis


def _round_up(n, m):
    return (n + m - 1) // m * m


def _tpu_generation():
    """Return (num_tensorcores, bf16_vpu_eup_ok) from the attached device kind.

    Falls back to the conservative (1 TC, f32 swish) setting if unknown.
    """
    try:
        kind = jax.devices()[0].device_kind.lower()
    except Exception:
        return 1, False
    num_tc = 2 if "v7" in kind else 1
    bf16_ok = ("v6" in kind) or ("v7" in kind)
    return num_tc, bf16_ok


def discritor_cam_kernel(x_ref,
                         w1_ref, b1_ref,
                         w2_ref, b2_ref,
                         w3_ref, b3_ref,
                         w4_ref, b4_ref,
                         o_ref, *, camidnum, swish_dtype):
    # x arrives as f32 (no wrapper-side cast pass over HBM); cast to bf16 on
    # the VPU so all four matmuls run at bf16 MXU rate with f32 accumulation.
    h = x_ref[...].astype(jnp.bfloat16)

    def layer(h, w_ref, b_ref):
        acc = jnp.dot(h, w_ref[...], preferred_element_type=jnp.float32) + b_ref[...]
        s = acc.astype(swish_dtype)            # bf16 swish on v6e/v7x, f32 on v5e
        return (s * jax.nn.sigmoid(s)).astype(jnp.bfloat16)

    h = layer(h, w1_ref, b1_ref)
    h = layer(h, w2_ref, b2_ref)
    h = layer(h, w3_ref, b3_ref)
    out = jnp.dot(h, w4_ref[...], preferred_element_type=jnp.float32) + b4_ref[...]
    # Only the first camidnum lanes are real; store just those (masked vst but
    # ~16x less HBM write traffic than a 128-lane f32 slab).
    o_ref[...] = out[:, :camidnum].astype(o_ref.dtype)


def _prepare_params(params):
    """Zero-pad layer 3/4 widths to 128 lanes and cast weights to bf16.

    Biases stay f32 (post-matmul math starts in f32). Padding is exact:
    padded h3 lanes are swish(0) = 0 and the padded w4 rows/cols are 0.
    """
    def pad_to(a, shape):
        return jnp.pad(a, [(0, t - s) for s, t in zip(a.shape, shape)])

    camidnum = params["w4"].shape[1]
    h3_pad = _round_up(params["w3"].shape[1], LANE)   # 64  -> 128
    out_pad = _round_up(camidnum, LANE)               # cam -> 128 (matmul width)

    prepped = {
        "w1": params["w1"].astype(jnp.bfloat16),
        "b1": params["b1"].astype(jnp.float32),
        "w2": params["w2"].astype(jnp.bfloat16),
        "b2": params["b2"].astype(jnp.float32),
        "w3": pad_to(params["w3"], (params["w3"].shape[0], h3_pad)).astype(jnp.bfloat16),
        "b3": pad_to(params["b3"], (1, h3_pad)).astype(jnp.float32),
        "w4": pad_to(params["w4"], (h3_pad, out_pad)).astype(jnp.bfloat16),
        "b4": pad_to(params["b4"], (1, out_pad)).astype(jnp.float32),
    }
    return prepped, camidnum


def _choose_tiling(B, block_b, num_tc):
    """Balanced batch tiling. Single big tile on 1-TC chips when B fits; on
    v7x force an even step count (>= 2) so both TensorCores get equal work."""
    B_al = _round_up(max(B, SUBLANE_ALIGN), SUBLANE_ALIGN)
    steps = pl.cdiv(B_al, block_b)
    if num_tc >= 2:
        steps = max(steps, 2)
        steps += steps % 2
    bb = _round_up(pl.cdiv(B_al, steps), SUBLANE_ALIGN)
    steps = pl.cdiv(B_al, bb)          # rounding bb up may shrink step count
    if num_tc >= 2:
        steps = max(steps, 2)
        steps += steps % 2
    return bb, steps * bb


def discritor_cam_forward(x, params, *, block_b=2048, bf16_swish=None, num_tc=None):
    """x: [B, infeat_dim] float32. params: dict of transposed f32 weights/biases."""
    B, infeat = x.shape
    prepped, camidnum = _prepare_params(params)

    auto_tc, auto_bf16 = _tpu_generation()
    if num_tc is None:
        num_tc = auto_tc
    if bf16_swish is None:
        bf16_swish = auto_bf16

    bb, B_pad = _choose_tiling(B, block_b, num_tc)
    x_p = jnp.pad(x, ((0, B_pad - B), (0, 0))) if B_pad != B else x

    def weight_spec(shape):
        # Full (untiled) block, constant index -> resident across grid steps.
        return pl.BlockSpec(shape, lambda i: (0, 0))

    kernel = functools.partial(
        discritor_cam_kernel,
        camidnum=camidnum,
        swish_dtype=jnp.bfloat16 if bf16_swish else jnp.float32)

    out = pl.pallas_call(
        kernel,
        out_shape=jax.ShapeDtypeStruct((B_pad, camidnum), jnp.float32),
        grid_spec=pltpu.PrefetchScalarGridSpec(
            num_scalar_prefetch=0,
            grid=(B_pad // bb,),
            in_specs=[
                pl.BlockSpec((bb, infeat), lambda i: (i, 0)),   # x tile (f32)
                weight_spec(prepped["w1"].shape), weight_spec(prepped["b1"].shape),
                weight_spec(prepped["w2"].shape), weight_spec(prepped["b2"].shape),
                weight_spec(prepped["w3"].shape), weight_spec(prepped["b3"].shape),
                weight_spec(prepped["w4"].shape), weight_spec(prepped["b4"].shape),
            ],
            out_specs=pl.BlockSpec((bb, camidnum), lambda i: (i, 0)),
        ),
        compiler_params=pltpu.CompilerParams(
            dimension_semantics=("parallel",)),
    )(x_p,
      prepped["w1"], prepped["b1"],
      prepped["w2"], prepped["b2"],
      prepped["w3"], prepped["b3"],
      prepped["w4"], prepped["b4"])

    return out[:B] if B_pad != B else out


def init_params(key, infeat_dim, camidnum):
    """Deterministic init mimicking nn.Linear's default U(-1/sqrt(fan_in), ...).
    Weights are returned already transposed to [in, out] in f32 (unpadded)."""
    dims = [(infeat_dim, 128), (128, 128), (128, 64), (64, camidnum)]
    params = {}
    for idx, (fan_in, fan_out) in enumerate(dims, start=1):
        key, kw, kb = jax.random.split(key, 3)
        bound = 1.0 / jnp.sqrt(float(fan_in))
        params[f"w{idx}"] = jax.random.uniform(
            kw, (fan_in, fan_out), jnp.float32, -bound, bound)
        params[f"b{idx}"] = jax.random.uniform(
            kb, (1, fan_out), jnp.float32, -bound, bound)
    return params


def reference_forward(x, params, swish_dtype):
    """Reference matching the kernel's dtype flow (bf16 matmul inputs, f32
    accumulation, swish in swish_dtype)."""
    h = x.astype(jnp.bfloat16)
    for idx in range(1, 5):
        w = params[f"w{idx}"].astype(jnp.bfloat16)
        b = params[f"b{idx}"].astype(jnp.float32)
        acc = jnp.dot(h, w, preferred_element_type=jnp.float32) + b
        if idx < 4:
            s = acc.astype(swish_dtype)
            h = (s * jax.nn.sigmoid(s)).astype(jnp.bfloat16)
        else:
            h = acc
    return h


def reference_forward_f32(x, params):
    """Pure-f32 reference (matches the original PyTorch module numerics)."""
    h = x
    for idx in range(1, 5):
        h = jnp.dot(h, params[f"w{idx}"]) + params[f"b{idx}"]
        if idx < 4:
            h = h * jax.nn.sigmoid(h)
    return h


if __name__ == "__main__":
    infeat_dim = 32
    camidnum = 8
    batch = 16

    key = jax.random.PRNGKey(0)
    key, kx = jax.random.split(key)
    x = jax.random.normal(kx, (batch, infeat_dim), jnp.float32)
    params = init_params(key, infeat_dim, camidnum)

    num_tc, bf16_swish = _tpu_generation()
    out = discritor_cam_forward(x, params, num_tc=num_tc, bf16_swish=bf16_swish)
    out = jax.block_until_ready(out)
    assert out.shape == (batch, camidnum)

    swish_dtype = jnp.bfloat16 if bf16_swish else jnp.float32
    ref = reference_forward(x, params, swish_dtype)
    err = float(jnp.max(jnp.abs(out - ref)))
    assert jnp.allclose(out, ref, atol=2e-2, rtol=2e-2), \
        f"max abs err vs dtype-matched ref {err}"

    ref32 = reference_forward_f32(x, params)
    err32 = float(jnp.max(jnp.abs(out - ref32)))
    assert jnp.allclose(out, ref32, atol=1e-1, rtol=1e-1), \
        f"max abs err vs pure-f32 ref {err32}"

    print("KERNEL_OK")
</pallas_src>

<mosaic_0001>
module attributes {stable_mosaic.version = 11 : i64} {
  func.func @discritor_cam_kernel(%arg0: i32, %arg1: memref<16x32xf32, #tpu.memory_space<vmem>>, %arg2: memref<32x128xbf16, #tpu.memory_space<vmem>>, %arg3: memref<1x128xf32, #tpu.memory_space<vmem>>, %arg4: memref<128x128xbf16, #tpu.memory_space<vmem>>, %arg5: memref<1x128xf32, #tpu.memory_space<vmem>>, %arg6: memref<128x128xbf16, #tpu.memory_space<vmem>>, %arg7: memref<1x128xf32, #tpu.memory_space<vmem>>, %arg8: memref<128x128xbf16, #tpu.memory_space<vmem>>, %arg9: memref<1x128xf32, #tpu.memory_space<vmem>>, %arg10: memref<16x8xf32, #tpu.memory_space<vmem>>) attributes {dimension_semantics = [#tpu.dimension_semantics<parallel>], iteration_bounds = array<i64: 1>, scalar_prefetch = 0 : i64, scratch_operands = 0 : i64, tpu.core_type = #tpu.core_type<tc>, window_params = [{transform_indices = @transform_0, window_bounds = array<i64: 16, 32>}, {pipeline_mode = #tpu.pipeline_mode<synchronous>, transform_indices = @transform_1, window_bounds = array<i64: 32, 128>}, {pipeline_mode = #tpu.pipeline_mode<synchronous>, transform_indices = @transform_2, window_bounds = array<i64: 1, 128>}, {pipeline_mode = #tpu.pipeline_mode<synchronous>, transform_indices = @transform_3, window_bounds = array<i64: 128, 128>}, {pipeline_mode = #tpu.pipeline_mode<synchronous>, transform_indices = @transform_4, window_bounds = array<i64: 1, 128>}, {pipeline_mode = #tpu.pipeline_mode<synchronous>, transform_indices = @transform_5, window_bounds = array<i64: 128, 128>}, {pipeline_mode = #tpu.pipeline_mode<synchronous>, transform_indices = @transform_6, window_bounds = array<i64: 1, 128>}, {pipeline_mode = #tpu.pipeline_mode<synchronous>, transform_indices = @transform_7, window_bounds = array<i64: 128, 128>}, {pipeline_mode = #tpu.pipeline_mode<synchronous>, transform_indices = @transform_8, window_bounds = array<i64: 1, 128>}, {transform_indices = @transform_9, window_bounds = array<i64: 16, 8>}]} {
    %c0 = arith.constant 0 : index
    %c0_0 = arith.constant 0 : index
    %0 = vector.load %arg1[%c0, %c0_0] : memref<16x32xf32, #tpu.memory_space<vmem>>, vector<16x32xf32>
    %1 = arith.truncf %0 : vector<16x32xf32> to vector<16x32xbf16>
    %c0_1 = arith.constant 0 : index
    %c0_2 = arith.constant 0 : index
    %2 = vector.load %arg2[%c0_1, %c0_2] : memref<32x128xbf16, #tpu.memory_space<vmem>>, vector<32x128xbf16>
    %cst = arith.constant dense<0.000000e+00> : vector<16x128xf32>
    %3 = tpu.matmul %1, %2, %cst {dimension_numbers = #tpu.dot_dimension_numbers<[1], [0], [0], [1], [0, 0, 1, 1], [], []>} : vector<16x32xbf16>, vector<32x128xbf16>, vector<16x128xf32> -> vector<16x128xf32>
    %c0_3 = arith.constant 0 : index
    %c0_4 = arith.constant 0 : index
    %4 = vector.load %arg3[%c0_3, %c0_4] : memref<1x128xf32, #tpu.memory_space<vmem>>, vector<1x128xf32>
    %5 = vector.broadcast %4 : vector<1x128xf32> to vector<16x128xf32>
    %6 = arith.addf %3, %5 : vector<16x128xf32>
    %7 = arith.negf %6 : vector<16x128xf32>
    %8 = math.exp %7 : vector<16x128xf32>
    %cst_5 = arith.constant 1.000000e+00 : f32
    %9 = vector.broadcast %cst_5 : f32 to vector<16x128xf32>
    %10 = arith.addf %9, %8 : vector<16x128xf32>
    %11 = arith.divf %9, %10 : vector<16x128xf32>
    %12 = arith.mulf %6, %11 : vector<16x128xf32>
    %13 = arith.truncf %12 : vector<16x128xf32> to vector<16x128xbf16>
    %c0_6 = arith.constant 0 : index
    %c0_7 = arith.constant 0 : index
    %14 = vector.load %arg4[%c0_6, %c0_7] : memref<128x128xbf16, #tpu.memory_space<vmem>>, vector<128x128xbf16>
    %cst_8 = arith.constant dense<0.000000e+00> : vector<16x128xf32>
    %15 = tpu.matmul %13, %14, %cst_8 {dimension_numbers = #tpu.dot_dimension_numbers<[1], [0], [0], [1], [0, 0, 1, 1], [], []>} : vector<16x128xbf16>, vector<128x128xbf16>, vector<16x128xf32> -> vector<16x128xf32>
    %c0_9 = arith.constant 0 : index
    %c0_10 = arith.constant 0 : index
    %16 = vector.load %arg5[%c0_9, %c0_10] : memref<1x128xf32, #tpu.memory_space<vmem>>, vector<1x128xf32>
    %17 = vector.broadcast %16 : vector<1x128xf32> to vector<16x128xf32>
    %18 = arith.addf %15, %17 : vector<16x128xf32>
    %19 = arith.negf %18 : vector<16x128xf32>
    %20 = math.exp %19 : vector<16x128xf32>
    %cst_11 = arith.constant 1.000000e+00 : f32
    %21 = vector.broadcast %cst_11 : f32 to vector<16x128xf32>
    %22 = arith.addf %21, %20 : vector<16x128xf32>
    %23 = arith.divf %21, %22 : vector<16x128xf32>
    %24 = arith.mulf %18, %23 : vector<16x128xf32>
    %25 = arith.truncf %24 : vector<16x128xf32> to vector<16x128xbf16>
    %c0_12 = arith.constant 0 : index
    %c0_13 = arith.constant 0 : index
    %26 = vector.load %arg6[%c0_12, %c0_13] : memref<128x128xbf16, #tpu.memory_space<vmem>>, vector<128x128xbf16>
    %cst_14 = arith.constant dense<0.000000e+00> : vector<16x128xf32>
    %27 = tpu.matmul %25, %26, %cst_14 {dimension_numbers = #tpu.dot_dimension_numbers<[1], [0], [0], [1], [0, 0, 1, 1], [], []>} : vector<16x128xbf16>, vector<128x128xbf16>, vector<16x128xf32> -> vector<16x128xf32>
    %c0_15 = arith.constant 0 : index
    %c0_16 = arith.constant 0 : index
    %28 = vector.load %arg7[%c0_15, %c0_16] : memref<1x128xf32, #tpu.memory_space<vmem>>, vector<1x128xf32>
    %29 = vector.broadcast %28 : vector<1x128xf32> to vector<16x128xf32>
    %30 = arith.addf %27, %29 : vector<16x128xf32>
    %31 = arith.negf %30 : vector<16x128xf32>
    %32 = math.exp %31 : vector<16x128xf32>
    %cst_17 = arith.constant 1.000000e+00 : f32
    %33 = vector.broadcast %cst_17 : f32 to vector<16x128xf32>
    %34 = arith.addf %33, %32 : vector<16x128xf32>
    %35 = arith.divf %33, %34 : vector<16x128xf32>
    %36 = arith.mulf %30, %35 : vector<16x128xf32>
    %37 = arith.truncf %36 : vector<16x128xf32> to vector<16x128xbf16>
    %c0_18 = arith.constant 0 : index
    %c0_19 = arith.constant 0 : index
    %38 = vector.load %arg8[%c0_18, %c0_19] : memref<128x128xbf16, #tpu.memory_space<vmem>>, vector<128x128xbf16>
    %cst_20 = arith.constant dense<0.000000e+00> : vector<16x128xf32>
    %39 = tpu.matmul %37, %38, %cst_20 {dimension_numbers = #tpu.dot_dimension_numbers<[1], [0], [0], [1], [0, 0, 1, 1], [], []>} : vector<16x128xbf16>, vector<128x128xbf16>, vector<16x128xf32> -> vector<16x128xf32>
    %c0_21 = arith.constant 0 : index
    %c0_22 = arith.constant 0 : index
    %40 = vector.load %arg9[%c0_21, %c0_22] : memref<1x128xf32, #tpu.memory_space<vmem>>, vector<1x128xf32>
    %41 = vector.broadcast %40 : vector<1x128xf32> to vector<16x128xf32>
    %42 = arith.addf %39, %41 : vector<16x128xf32>
    %43 = vector.extract_strided_slice %42 {offsets = [0, 0], sizes = [16, 8], strides = [1, 1]} : vector<16x128xf32> to vector<16x8xf32>
    %c0_23 = arith.constant 0 : index
    %c0_24 = arith.constant 0 : index
    %44 = vector.load %arg10[%c0_23, %c0_24] : memref<16x8xf32, #tpu.memory_space<vmem>>, vector<16x8xf32>
    tpu.vector_store %arg10[%c0_23, %c0_24], %43 {strides = array<i32>} : memref<16x8xf32, #tpu.memory_space<vmem>>, vector<16x8xf32>,
    return
  }
  func.func @transform_0(%arg0: i32) -> (i32, i32) {
    %c0_i32 = arith.constant 0 : i32
    %c0_i32_0 = arith.constant 0 : i32
    return %arg0, %c0_i32 : i32, i32
  }
  func.func @transform_1(%arg0: i32) -> (i32, i32) {
    %c0_i32 = arith.constant 0 : i32
    %c0_i32_0 = arith.constant 0 : i32
    %c0_i32_1 = arith.constant 0 : i32
    return %c0_i32, %c0_i32_0 : i32, i32
  }
  func.func @transform_2(%arg0: i32) -> (i32, i32) {
    %c0_i32 = arith.constant 0 : i32
    %c0_i32_0 = arith.constant 0 : i32
    %c0_i32_1 = arith.constant 0 : i32
    return %c0_i32, %c0_i32_0 : i32, i32
  }
  func.func @transform_3(%arg0: i32) -> (i32, i32) {
    %c0_i32 = arith.constant 0 : i32
    %c0_i32_0 = arith.constant 0 : i32
    %c0_i32_1 = arith.constant 0 : i32
    return %c0_i32, %c0_i32_0 : i32, i32
  }
  func.func @transform_4(%arg0: i32) -> (i32, i32) {
    %c0_i32 = arith.constant 0 : i32
    %c0_i32_0 = arith.constant 0 : i32
    %c0_i32_1 = arith.constant 0 : i32
    return %c0_i32, %c0_i32_0 : i32, i32
  }
  func.func @transform_5(%arg0: i32) -> (i32, i32) {
    %c0_i32 = arith.constant 0 : i32
    %c0_i32_0 = arith.constant 0 : i32
    %c0_i32_1 = arith.constant 0 : i32
    return %c0_i32, %c0_i32_0 : i32, i32
  }
  func.func @transform_6(%arg0: i32) -> (i32, i32) {
    %c0_i32 = arith.constant 0 : i32
    %c0_i32_0 = arith.constant 0 : i32
    %c0_i32_1 = arith.constant 0 : i32
    return %c0_i32, %c0_i32_0 : i32, i32
  }
  func.func @transform_7(%arg0: i32) -> (i32, i32) {
    %c0_i32 = arith.constant 0 : i32
    %c0_i32_0 = arith.constant 0 : i32
    %c0_i32_1 = arith.constant 0 : i32
    return %c0_i32, %c0_i32_0 : i32, i32
  }
  func.func @transform_8(%arg0: i32) -> (i32, i32) {
    %c0_i32 = arith.constant 0 : i32
    %c0_i32_0 = arith.constant 0 : i32
    %c0_i32_1 = arith.constant 0 : i32
    return %c0_i32, %c0_i32_0 : i32, i32
  }
  func.func @transform_9(%arg0: i32) -> (i32, i32) {
    %c0_i32 = arith.constant 0 : i32
    %c0_i32_0 = arith.constant 0 : i32
    return %arg0, %c0_i32 : i32, i32
  }
}

</mosaic_0001>

<bundles_post_ra>
// kernel: tpu_custom_call.1
= control target key start
LH: loop header
LB: loop body
LE: loop exit
PB: predicated region body
PF: predicated region fallthrough
CT: control target
= control target key end

     0   :  { %14 = vsyncpa [#allocation3], 0  ;;  %s935_s0 = inlined_call_operand.hbm [shape: f32[16,32], index: 0, kind: input, shape index: {}]   ;;  %s936_s1 = inlined_call_operand.hbm [shape: bf16[32,128], index: 1, kind: input, shape index: {}]   ;;  %s937_s2 = inlined_call_operand.vmem [shape: f32[1,128], index: 2, kind: input, shape index: {}]   ;;  %s938_s3 = inlined_call_operand.hbm [shape: bf16[128,128], index: 3, kind: input, shape index: {}]   ;;  %s939_s4 = inlined_call_operand.vmem [shape: f32[1,128], index: 4, kind: input, shape index: {}]   ;;  %s940_s5 = inlined_call_operand.hbm [shape: bf16[128,128], index: 5, kind: input, shape index: {}]   ;;  %s941_s6 = inlined_call_operand.vmem [shape: f32[1,128], index: 6, kind: input, shape index: {}]   ;;  %s942_s7 = inlined_call_operand.hbm [shape: bf16[128,128], index: 7, kind: input, shape index: {}]   ;;  %s943_s8 = inlined_call_operand.vmem [shape: f32[1,128], index: 8, kind: input, shape index: {}]   ;;  %s944_s9 = inlined_call_operand.vmem [shape: f32[16,8], index: 9, kind: output, shape index: {}]  }
   0x1   :  { %15 = vsyncpa [#allocation5], 0  ;;  %s34_s11 = sshll.u32 %s936_s1, 4  ;;  %s35_s11 = int_to_ptr.hbm [resolvable:$true] %s34_s11 }
   0x2   :  { %16 = vsyncpa [#allocation8], 0  ;;  %s831_s12 = smov [#allocation4]   ;;  %s64_s16 = sshll.u32 %s940_s5, 4  ;;  %s65_s16 = int_to_ptr.hbm [resolvable:$true] %s64_s16 }
   0x3   :  { %s36_s13 = sshll.u32 %s831_s12, 4  ;;  %s832_s17 = smov 64   ;;  %s37_s13 = int_to_ptr.vmem [resolvable:$true] %s36_s13 }
   0x4   :  { %s833_s18 = smov 4   ;;  %s834_s19 = smov [#allocation7]  }
   0x5   :  { %42 = dma.hbm_to_vmem [thread:$0]  %s35_s11, 256, %s37_s13, [#allocation5], %s832_s17, %s832_s17, %s833_s18  }
   0x6   :  { %s66_s20 = sshll.u32 %s834_s19, 4  ;;  %s21_s22 = sshll.u32 %s935_s0, 4  ;;  %s67_s20 = int_to_ptr.vmem [resolvable:$true] %s66_s20  ;;  %s22_s22 = int_to_ptr.hbm [resolvable:$true] %s21_s22 }
   0x7   :  { %72 = dma.hbm_to_vmem [thread:$0]  %s65_s16, 1024, %s67_s20, [#allocation8], %s832_s17, %s832_s17, %s833_s18  }
   0x8   :  { %s835_s5 = smov [#allocation2]   ;;  %s49_s26 = sshll.u32 %s938_s3, 4  ;;  %s50_s26 = int_to_ptr.hbm [resolvable:$true] %s49_s26 }
   0x9   :  { %s23_s23 = sshll.u32 %s835_s5, 4  ;;  %s836_s27 = smov 128   ;;  %s24_s23 = int_to_ptr.vmem [resolvable:$true] %s23_s23 }
   0xa   :  { %s837_s28 = smov 8   ;;  %s838_s29 = smov [#allocation6]  }
   0xb   :  { %29 = dma.hbm_to_vmem [thread:$0]  %s22_s22, 256, %s24_s23, [#allocation3], %s836_s27, %s836_s27, %s837_s28  }
   0xc   :  { %s51_s30 = sshll.u32 %s838_s29, 4  ;;  %s79_s11 = sshll.u32 %s942_s7, 4  ;;  %s52_s30 = int_to_ptr.vmem [resolvable:$true] %s51_s30  ;;  %s80_s11 = int_to_ptr.hbm [resolvable:$true] %s79_s11 }
   0xd   :  { %57 = dma.hbm_to_vmem [thread:$0]  %s50_s26, 1024, %s52_s30, [#allocation5], %s832_s17, %s832_s17, %s833_s18  }
   0xe   :  { %s839_s12 = smov [#allocation9]  }
   0xf   :  { %s81_s13 = sshll.u32 %s839_s12, 4  ;;  %s82_s13 = int_to_ptr.vmem [resolvable:$true] %s81_s13 }
  0x10   :  { %87 = dma.hbm_to_vmem [thread:$0]  %s80_s11, 1024, %s82_s13, [#allocation8], %s832_s17, %s832_s17, %s833_s18  }
  0x11   :  { %825 = dma.done.wait [#allocation3], 256  }
  0x12   :  { %826 = vsyncadd [#allocation3], 4294967040 }
  0x13   :  { %827 = dma.done.wait [#allocation5], 1280  }
  0x14   :  { %828 = vsyncadd [#allocation5], 4294966016 }
  0x15   :  { %829 = dma.done.wait [#allocation8], 2048  }
  0x16   :  { %830 = vsyncadd [#allocation8], 4294965248  ;;  %v643_v0 = vld [vmem:[#allocation4 + $0x8] sm:$0xff]  ;;  %v642_v1 = vld [vmem:[#allocation4] sm:$0xff]  ;;  %vm134_vm0 = vcmask 261120  }
  0x17   :  { %v111_v2 = vld [vmem:[#allocation2] sm:$0xff]  ;;  %v112_v3 = vld [vmem:[#allocation2 + $0x8] sm:$0xff]  ;;  %144 = vmatpush.bf16.msra.mxu0 %v643_v0  ;;  %v651_v5 = vld [vmem:[#allocation6 + $0x38] sm:$0xff] }
  0x18   :  { %v113_v4 = vpack.c.bf16 %v112_v3, %v111_v2  ;;  %261 = vmatpush.bf16.msra.mxu1 %v651_v5  ;;  %v650_v6 = vld [vmem:[#allocation6 + $0x30] sm:$0xff]  ;;  %v649_v7 = vld [vmem:[#allocation6 + $0x28] sm:$0xff]  ;;  %v648_v8 = vld [vmem:[#allocation6 + $0x20] sm:$0xff] }
  0x19   :  { %v647_v9 = vld [vmem:[#allocation6 + $0x18] sm:$0xff]  ;;  %v677_v10 = vld [vmem:[%s937_s2] ss:$0 sm:$0xff]  ;;  %v646_v11 = vld [vmem:[#allocation6 + $0x10] sm:$0xff] }
  0x1a   :  { %v645_v14 = vld [vmem:[#allocation6 + $0x8] sm:$0xff]  ;;  %v644_v16 = vld [vmem:[#allocation6] sm:$0xff]  ;;  %v659_v47 = vld [vmem:[#allocation7 + $0x38] sm:$0xff] }
  0x1b   :  { %145 = vmatpush.bf16.msra.mxu0 %v642_v1  ;;  %384 = vmatpush.bf16.msra.mxu2 %v659_v47  ;;  %v658_v48 = vld [vmem:[#allocation7 + $0x30] sm:$0xff]  ;;  %v657_v49 = vld [vmem:[#allocation7 + $0x28] sm:$0xff]  ;;  %v656_v50 = vld [vmem:[#allocation7 + $0x20] sm:$0xff] }
  0x1c   :  { %262 = vmatpush.bf16.msra.mxu1 %v650_v6  ;;  %v655_v51 = vld [vmem:[#allocation7 + $0x18] sm:$0xff]  ;;  %v678_v52 = vld [vmem:[%s939_s4] ss:$0 sm:$0xff]  ;;  %v654_v53 = vld [vmem:[#allocation7 + $0x10] sm:$0xff] }
  0x1d   :  { %v653_v56 = vld [vmem:[#allocation7 + $0x8] sm:$0xff]  ;;  %v652_v58 = vld [vmem:[#allocation7] sm:$0xff] }
  0x1e   :  { %539 = vmatmul.msk.bf16.vlgmr.msra.gmra.mxu0 %vm134_vm0, %v113_v4 }
  0x1f   :  { %385 = vmatpush.bf16.msra.mxu2 %v658_v48 }
  0x20   :  { %263 = vmatpush.bf16.msra.mxu1 %v649_v7 }
  0x23   :  { %386 = vmatpush.bf16.msra.mxu2 %v657_v49 }
  0x24   :  { %264 = vmatpush.bf16.msra.mxu1 %v648_v8 }
  0x27   :  { %387 = vmatpush.bf16.msra.mxu2 %v656_v50 }
  0x28   :  { %265 = vmatpush.bf16.msra.mxu1 %v647_v9 }
  0x2b   :  { %388 = vmatpush.bf16.msra.mxu2 %v655_v51 }
  0x2c   :  { %266 = vmatpush.bf16.msra.mxu1 %v646_v11 }
  0x2f   :  { %389 = vmatpush.bf16.msra.mxu2 %v654_v53 }
  0x30   :  { %267 = vmatpush.bf16.msra.mxu1 %v645_v14 }
  0x33   :  { %390 = vmatpush.bf16.msra.mxu2 %v653_v56 }
  0x34   :  { %268 = vmatpush.bf16.msra.mxu1 %v644_v16 }
  0x37   :  { %391 = vmatpush.bf16.msra.mxu2 %v652_v58 }
  0x9b   :  { %v147_v12 = vpop.f32.mrf.mxu0 }
  0x9c   :  { %v148_v13 = vadd.f32 %v677_v10, %v147_v12 }
  0x9e   :  { %v540_v15 = vmul.f32 -1.442695, %v148_v13 }
  0xa0   :  { %681 = vpow2.f32 %v540_v15 }
  0xa3   :  { %v149_v17 = vpop.f32.mrf.mxu0 }
  0xa4   :  { %v150_v18 = vadd.f32 %v677_v10, %v149_v17 }
  0xa6   :  { %v682_v19 = vpop.eup %681  ;;  %v541_v20 = vmul.f32 -1.442695, %v150_v18 }
  0xa7   :  { %v158_v21 = vadd.f32 1.0, %v682_v19 }
  0xa8   :  { %683 = vpow2.f32 %v541_v20 }
  0xa9   :  { %685 = vrcp.f32 %v158_v21  ;;  %v171_v31 = vand.u32 2147483648, %v158_v21  ;;  %vm165_vm2 = vweird.f32 %v158_v21  ;;  %v169_v32 = vand.u32 2147483647, %v158_v21 }
  0xab   :  { %v172_v38 = vor.u32 1.1754944e-38, %v171_v31  ;;  %vm170_vm5 = vcmp.eq.f32.partialorder %v169_v32, 8.507059e+37  ;;  %v662_v31 = vld [vmem:[#allocation9 + $0x10] sm:$0xff] }
  0xae   :  { %v684_v22 = vpop.eup %683 }
  0xaf   :  { %v686_v23 = vpop.eup %685  ;;  %v159_v24 = vadd.f32 1.0, %v684_v22 }
  0xb0   :  { %v161_v25 = vmul.f32 %v686_v23, %v158_v21  ;;  %vm166_vm1 = vweird.f32 %v686_v23 }
  0xb1   :  { %687 = vrcp.f32 %v159_v24  ;;  %vm167_vm3 = vmor %vm165_vm2, %vm166_vm1  ;;  %v186_v34 = vand.u32 2147483648, %v159_v24  ;;  %v184_v37 = vand.u32 2147483647, %v159_v24  ;;  %vm180_vm6 = vweird.f32 %v159_v24 }
  0xb2   :  { %v162_v26 = vsub.f32 1.0, %v161_v25  ;;  %v667_v25 = vld [vmem:[#allocation9 + $0x38] sm:$0xff] }
  0xb3   :  { %v187_v41 = vor.u32 1.1754944e-38, %v186_v34  ;;  %vm185_vm8 = vcmp.eq.f32.partialorder %v184_v37, 8.507059e+37  ;;  %507 = vmatpush.bf16.msra.mxu3 %v667_v25  ;;  %v661_v34 = vld [vmem:[#allocation9 + $0x8] sm:$0xff] }
  0xb4   :  { %v163_v27 = vmul.f32 %v686_v23, %v162_v26  ;;  %v666_v26 = vld [vmem:[#allocation9 + $0x30] sm:$0xff] }
  0xb6   :  { %v164_v29 = vadd.f32 %v686_v23, %v163_v27  ;;  %v665_v27 = vld [vmem:[#allocation9 + $0x28] sm:$0xff] }
  0xb7   :  { %v688_v28 = vpop.eup %687  ;;  %508 = vmatpush.bf16.msra.mxu3 %v666_v26 }
  0xb8   :  { %v176_v30 = vmul.f32 %v688_v28, %v159_v24  ;;  %v168_v35 = vsel %vm167_vm3, %v686_v23, %v164_v29  ;;  %vm181_vm4 = vweird.f32 %v688_v28  ;;  %v663_v29 = vld [vmem:[#allocation9 + $0x18] sm:$0xff] }
  0xb9   :  { %v173_v40 = vsel %vm170_vm5, %v172_v38, %v168_v35  ;;  %vm182_vm7 = vmor %vm180_vm6, %vm181_vm4 }
  0xba   :  { %v177_v33 = vsub.f32 1.0, %v176_v30  ;;  %v190_v44 = vmul.f32 %v173_v40, %v148_v13  ;;  %v679_v30 = vld [vmem:[%s941_s6] ss:$0 sm:$0xff] }
  0xbb   :  { %509 = vmatpush.bf16.msra.mxu3 %v665_v27 }
  0xbc   :  { %v178_v36 = vmul.f32 %v688_v28, %v177_v33 }
  0xbe   :  { %v179_v39 = vadd.f32 %v688_v28, %v178_v36  ;;  %v660_v36 = vld [vmem:[#allocation9] sm:$0xff] }
  0xc0   :  { %v183_v42 = vsel %vm182_vm7, %v688_v28, %v179_v39  ;;  %v664_v28 = vld [vmem:[#allocation9 + $0x20] sm:$0xff] }
  0xc1   :  { %v188_v43 = vsel %vm185_vm8, %v187_v41, %v183_v42  ;;  %510 = vmatpush.bf16.msra.mxu3 %v664_v28 }
  0xc2   :  { %v191_v45 = vmul.f32 %v188_v43, %v150_v18 }
  0xc4   :  { %v192_v46 = vpack.c.bf16 %v191_v45, %v190_v44 }
  0xc5   :  { %511 = vmatpush.bf16.msra.mxu3 %v663_v29 }
  0xc6   :  { %269 = vmatmul.bf16.vlgmr.msra.gmra.mxu1 %v192_v46 }
  0xc9   :  { %512 = vmatpush.bf16.msra.mxu3 %v662_v31 }
  0xcd   :  { %513 = vmatpush.bf16.msra.mxu3 %v661_v34 }
  0xd1   :  { %514 = vmatpush.bf16.msra.mxu3 %v660_v36 }
 0x143   :  { %v270_v54 = vpop.f32.mrf.mxu1 }
 0x144   :  { %v271_v55 = vadd.f32 %v678_v52, %v270_v54 }
 0x146   :  { %v574_v57 = vmul.f32 -1.442695, %v271_v55 }
 0x148   :  { %689 = vpow2.f32 %v574_v57 }
 0x14b   :  { %v272_v59 = vpop.f32.mrf.mxu1 }
 0x14c   :  { %v273_v60 = vadd.f32 %v678_v52, %v272_v59 }
 0x14e   :  { %v690_v61 = vpop.eup %689  ;;  %v575_v62 = vmul.f32 -1.442695, %v273_v60 }
 0x14f   :  { %v281_v63 = vadd.f32 1.0, %v690_v61 }
 0x150   :  { %691 = vpow2.f32 %v575_v62 }
 0x151   :  { %693 = vrcp.f32 %v281_v63  ;;  %v294_v9 = vand.u32 2147483648, %v281_v63  ;;  %vm288_vm10 = vweird.f32 %v281_v63  ;;  %v292_v10 = vand.u32 2147483647, %v281_v63 }
 0x153   :  { %v295_v16 = vor.u32 1.1754944e-38, %v294_v9  ;;  %vm293_vm13 = vcmp.eq.f32.partialorder %v292_v10, 8.507059e+37 }
 0x156   :  { %v692_v0 = vpop.eup %691 }
 0x157   :  { %v694_v1 = vpop.eup %693  ;;  %v282_v2 = vadd.f32 1.0, %v692_v0 }
 0x158   :  { %v284_v3 = vmul.f32 %v694_v1, %v281_v63  ;;  %vm289_vm9 = vweird.f32 %v694_v1 }
 0x159   :  { %695 = vrcp.f32 %v282_v2  ;;  %vm290_vm11 = vmor %vm288_vm10, %vm289_vm9  ;;  %v309_v12 = vand.u32 2147483648, %v282_v2  ;;  %v307_v15 = vand.u32 2147483647, %v282_v2  ;;  %vm303_vm14 = vweird.f32 %v282_v2 }
 0x15a   :  { %v285_v4 = vsub.f32 1.0, %v284_v3  ;;  %v680_v3 = vld [vmem:[%s943_s8] ss:$0 sm:$0xff]  ;;  %vm521_vm9 = vcmask 64512  }
 0x15b   :  { %v310_v19 = vor.u32 1.1754944e-38, %v309_v12  ;;  %vm308_vm0 = vcmp.eq.f32.partialorder %v307_v15, 8.507059e+37 }
 0x15c   :  { %v286_v5 = vmul.f32 %v694_v1, %v285_v4 }
 0x15e   :  { %v287_v7 = vadd.f32 %v694_v1, %v286_v5 }
 0x15f   :  { %v696_v6 = vpop.eup %695 }
 0x160   :  { %v299_v8 = vmul.f32 %v696_v6, %v282_v2  ;;  %v291_v13 = vsel %vm290_vm11, %v694_v1, %v287_v7  ;;  %vm304_vm12 = vweird.f32 %v696_v6 }
 0x161   :  { %v296_v18 = vsel %vm293_vm13, %v295_v16, %v291_v13  ;;  %vm305_vm15 = vmor %vm303_vm14, %vm304_vm12 }
 0x162   :  { %v300_v11 = vsub.f32 1.0, %v299_v8  ;;  %v313_v22 = vmul.f32 %v296_v18, %v271_v55 }
 0x164   :  { %v301_v14 = vmul.f32 %v696_v6, %v300_v11 }
 0x166   :  { %v302_v17 = vadd.f32 %v696_v6, %v301_v14 }
 0x168   :  { %v306_v20 = vsel %vm305_vm15, %v696_v6, %v302_v17 }
 0x169   :  { %v311_v21 = vsel %vm308_vm0, %v310_v19, %v306_v20 }
 0x16a   :  { %v314_v23 = vmul.f32 %v311_v21, %v273_v60 }
 0x16c   :  { %v315_v24 = vpack.c.bf16 %v314_v23, %v313_v22 }
 0x16e   :  { %392 = vmatmul.bf16.vlgmr.msra.gmra.mxu2 %v315_v24 }
 0x1f1   :  { %v393_v32 = vpop.f32.mrf.mxu2 }
 0x1f2   :  { %v394_v33 = vadd.f32 %v679_v30, %v393_v32 }
 0x1f4   :  { %v608_v35 = vmul.f32 -1.442695, %v394_v33 }
 0x1f6   :  { %697 = vpow2.f32 %v608_v35 }
 0x1f9   :  { %v395_v37 = vpop.f32.mrf.mxu2 }
 0x1fa   :  { %v396_v38 = vadd.f32 %v679_v30, %v395_v37 }
 0x1fc   :  { %v698_v39 = vpop.eup %697  ;;  %v609_v40 = vmul.f32 -1.442695, %v396_v38 }
 0x1fd   :  { %v404_v41 = vadd.f32 1.0, %v698_v39 }
 0x1fe   :  { %699 = vpow2.f32 %v609_v40 }
 0x1ff   :  { %701 = vrcp.f32 %v404_v41  ;;  %v417_v51 = vand.u32 2147483648, %v404_v41  ;;  %vm411_vm2 = vweird.f32 %v404_v41  ;;  %v415_v52 = vand.u32 2147483647, %v404_v41 }
 0x201   :  { %v418_v58 = vor.u32 1.1754944e-38, %v417_v51  ;;  %vm416_vm5 = vcmp.eq.f32.partialorder %v415_v52, 8.507059e+37 }
 0x204   :  { %v700_v42 = vpop.eup %699 }
 0x205   :  { %v702_v43 = vpop.eup %701  ;;  %v405_v44 = vadd.f32 1.0, %v700_v42 }
 0x206   :  { %v407_v45 = vmul.f32 %v702_v43, %v404_v41  ;;  %vm412_vm1 = vweird.f32 %v702_v43 }
 0x207   :  { %703 = vrcp.f32 %v405_v44  ;;  %vm413_vm3 = vmor %vm411_vm2, %vm412_vm1  ;;  %v432_v54 = vand.u32 2147483648, %v405_v44  ;;  %v430_v57 = vand.u32 2147483647, %v405_v44  ;;  %vm426_vm6 = vweird.f32 %v405_v44 }
 0x208   :  { %v408_v46 = vsub.f32 1.0, %v407_v45 }
 0x209   :  { %v433_v61 = vor.u32 1.1754944e-38, %v432_v54  ;;  %vm431_vm8 = vcmp.eq.f32.partialorder %v430_v57, 8.507059e+37 }
 0x20a   :  { %v409_v47 = vmul.f32 %v702_v43, %v408_v46 }
 0x20c   :  { %v410_v49 = vadd.f32 %v702_v43, %v409_v47 }
 0x20d   :  { %v704_v48 = vpop.eup %703 }
 0x20e   :  { %v422_v50 = vmul.f32 %v704_v48, %v405_v44  ;;  %v414_v55 = vsel %vm413_vm3, %v702_v43, %v410_v49  ;;  %vm427_vm4 = vweird.f32 %v704_v48 }
 0x20f   :  { %v419_v60 = vsel %vm416_vm5, %v418_v58, %v414_v55  ;;  %vm428_vm7 = vmor %vm426_vm6, %vm427_vm4 }
 0x210   :  { %v423_v53 = vsub.f32 1.0, %v422_v50  ;;  %v436_v0 = vmul.f32 %v419_v60, %v394_v33 }
 0x212   :  { %v424_v56 = vmul.f32 %v704_v48, %v423_v53 }
 0x214   :  { %v425_v59 = vadd.f32 %v704_v48, %v424_v56 }
 0x216   :  { %v429_v62 = vsel %vm428_vm7, %v704_v48, %v425_v59 }
 0x217   :  { %v434_v63 = vsel %vm431_vm8, %v433_v61, %v429_v62 }
 0x218   :  { %v437_v1 = vmul.f32 %v434_v63, %v396_v38 }
 0x21a   :  { %v438_v2 = vpack.c.bf16 %v437_v1, %v436_v0 }
 0x21c   :  { %515 = vmatmul.bf16.vlgmr.msra.gmra.mxu3 %v438_v2 }
 0x29f   :  { %v516_v4 = vpop.f32.mrf.mxu3 }
 0x2a0   :  { %v517_v5 = vadd.f32 %v680_v3, %v516_v4 }
 0x2a2   :  { %522 = vst.msk [vmem:[%s944_s9] sm:$0xff] %vm521_vm9, %v517_v5 }
 0x2a7   :  { %v518_v6 = vpop.f32.mrf.mxu3 }
 0x2a8   :  { %v519_v7 = vadd.f32 %v680_v3, %v518_v6 }
 0x2aa   :  { %523 = vst.msk [vmem:[%s944_s9 + $0x8] sm:$0xff] %vm521_vm9, %v519_v7 }
 0x2ab   :  { %528 = vsyncpa [#allocation3], 1 }
 0x2ac   :  { %529 = vsyncpa [#allocation5], 1 }
 0x2ad   :  { %530 = vsyncpa [#allocation8], 1 }

</bundles_post_ra>
